<compile_context>
chip_gen: v5e
topology: v5e:2x2
jax: 0.10.0
libtpu: 0.0.40
codegen_flags: <defaults>
</compile_context>

<pallas_src>
import math

import jax
import jax.numpy as jnp
from jax.experimental import pallas as pl
from jax.experimental.pallas import tpu as pltpu


def _mlp2_kernel(
    x_ref,
    w_b0_ref, b_b0_ref, w_b1_ref, b_b1_ref,        # backbone
    w_h12_ref, b_h12_ref,                          # fused head-entry [h2a | h1a]
    w_h1b_ref, b_h1b_ref, w_h1c_ref, b_h1c_ref,    # rest of head1
    w_h2b_ref, b_h2b_ref,                          # rest of head2
    out_ref,
):
    x = x_ref[...]                                                    # (B, 6) f32

    # Backbone: Linear(6,64) -> ReLU -> Linear(64,64) -> ReLU
    h = jnp.dot(x, w_b0_ref[...], preferred_element_type=jnp.float32) + b_b0_ref[...]
    h = jnp.maximum(h, 0.0)
    h = jnp.dot(h, w_b1_ref[...], preferred_element_type=jnp.float32) + b_b1_ref[...]
    h = jnp.maximum(h, 0.0)                                           # (B, 64)

    # Fused head-entry matmul: one (64,192) dot instead of (64,128) + (64,64).
    # Column order is [head2 (128) | head1 (64)] so slices sit on a lane-128
    # vreg boundary (free views, no lane shuffle).
    h12 = jnp.dot(h, w_h12_ref[...], preferred_element_type=jnp.float32) + b_h12_ref[...]
    h12 = jnp.maximum(h12, 0.0)                                       # (B, 192)
    h2 = h12[:, :128]                                                 # head2 hidden
    h1 = h12[:, 128:192]                                              # head1 hidden

    # Head 1 (cont.): Linear(64,64) -> ReLU -> Linear(64,2)
    h1 = jnp.dot(h1, w_h1b_ref[...], preferred_element_type=jnp.float32) + b_h1b_ref[...]
    h1 = jnp.maximum(h1, 0.0)
    xy = jnp.dot(h1, w_h1c_ref[...], preferred_element_type=jnp.float32) + b_h1c_ref[...]  # (B, 2)

    # Head 2 (cont.): Linear(128,1) -> Tanh, scaled by pi/2
    th = jnp.dot(h2, w_h2b_ref[...], preferred_element_type=jnp.float32) + b_h2b_ref[...]  # (B, 1)
    th = (math.pi / 2.0) * jnp.tanh(th)

    # Direct slab stores instead of a lane-axis concatenate.
    out_ref[:, 0:2] = xy.astype(out_ref.dtype)
    out_ref[:, 2:3] = th.astype(out_ref.dtype)


def _prep_weights(params):
    """Fuse head-entry weights and reshape biases to (1, N) on the host."""
    (w_b0, b_b0, w_b1, b_b1,
     w_h1a, b_h1a, w_h1b, b_h1b, w_h1c, b_h1c,
     w_h2a, b_h2a, w_h2b, b_h2b) = params

    w_h12 = jnp.concatenate([w_h2a, w_h1a], axis=1)       # (64, 192), head2 first
    b_h12 = jnp.concatenate([b_h2a, b_h1a], axis=0)       # (192,)

    def row(b):
        return b.reshape(1, -1)

    return (
        w_b0, row(b_b0), w_b1, row(b_b1),
        w_h12, row(b_h12),
        w_h1b, row(b_h1b), w_h1c, row(b_h1c),
        w_h2b, row(b_h2b),
    )


def mlp2_forward(obj_pose, params, *, tile_b=None):
    """obj_pose: (B, 6) float32 -> (B, 3) float32.

    tile_b=None (or B <= tile_b): single fused call, everything VMEM-resident.
    tile_b=k (B % k == 0, k % 8 == 0): batch-tiled grid for large B; weights
    are fetched once (constant block index) and the batch axis is parallel.
    """
    B = obj_pose.shape[0]
    weights = _prep_weights(params)
    args = (obj_pose,) + weights

    # FLOPs of the 6 matmuls (2*M*K*N each), tanh counted as transcendental.
    flops = 2 * B * (6 * 64 + 64 * 64 + 64 * 192 + 64 * 64 + 64 * 2 + 128 * 1)
    bytes_accessed = sum(int(a.size) * 4 for a in args) + B * 3 * 4
    cost = pl.CostEstimate(flops=flops, transcendentals=B,
                           bytes_accessed=bytes_accessed)

    if tile_b is None or B <= tile_b:
        vmem_spec = pl.BlockSpec(memory_space=pltpu.MemorySpace.VMEM)
        return pl.pallas_call(
            _mlp2_kernel,
            in_specs=[vmem_spec] * len(args),
            out_specs=vmem_spec,
            out_shape=jax.ShapeDtypeStruct((B, 3), jnp.float32),
            cost_estimate=cost,
        )(*args)

    assert B % tile_b == 0 and tile_b % 8 == 0, "tile_b must divide B and be a multiple of 8"
    const_map = lambda i: (0, 0)                   # weights: same block every step
    in_specs = [pl.BlockSpec((tile_b, 6), lambda i: (i, 0))]
    in_specs += [pl.BlockSpec(w.shape, const_map) for w in weights]
    return pl.pallas_call(
        _mlp2_kernel,
        grid=(B // tile_b,),
        in_specs=in_specs,
        out_specs=pl.BlockSpec((tile_b, 3), lambda i: (i, 0)),
        out_shape=jax.ShapeDtypeStruct((B, 3), jnp.float32),
        compiler_params=pltpu.CompilerParams(dimension_semantics=("parallel",)),
        cost_estimate=cost,
    )(*args)


def init_params(key):
    """Deterministic init matching MLP2's layer shapes (weights as (in, out))."""
    shapes = [
        # backbone
        ((6, 64), (64,)),
        ((64, 64), (64,)),
        # head1
        ((64, 64), (64,)),
        ((64, 64), (64,)),
        ((64, 2), (2,)),
        # head2
        ((64, 128), (128,)),
        ((128, 1), (1,)),
    ]
    params = []
    for w_shape, b_shape in shapes:
        key, kw, kb = jax.random.split(key, 3)
        bound = 1.0 / math.sqrt(w_shape[0])   # PyTorch nn.Linear default uniform bound
        params.append(jax.random.uniform(kw, w_shape, jnp.float32, -bound, bound))
        params.append(jax.random.uniform(kb, b_shape, jnp.float32, -bound, bound))
    return params


def mlp2_reference(obj_pose, params):
    """Pure-JAX reference for correctness checking."""
    (w_b0, b_b0, w_b1, b_b1,
     w_h1a, b_h1a, w_h1b, b_h1b, w_h1c, b_h1c,
     w_h2a, b_h2a, w_h2b, b_h2b) = params
    h = jnp.maximum(obj_pose @ w_b0 + b_b0, 0.0)
    h = jnp.maximum(h @ w_b1 + b_b1, 0.0)
    h1 = jnp.maximum(h @ w_h1a + b_h1a, 0.0)
    h1 = jnp.maximum(h1 @ w_h1b + b_h1b, 0.0)
    xy = h1 @ w_h1c + b_h1c
    h2 = jnp.maximum(h @ w_h2a + b_h2a, 0.0)
    th = (math.pi / 2.0) * jnp.tanh(h2 @ w_h2b + b_h2b)
    return jnp.concatenate([xy, th], axis=1)


if __name__ == "__main__":
    key = jax.random.PRNGKey(0)
    key, kx = jax.random.split(key)
    B = 8
    obj_pose = jax.random.normal(kx, (B, 6), dtype=jnp.float32)
    params = init_params(key)

    # Default (single fused call) path.
    out = jax.block_until_ready(mlp2_forward(obj_pose, params))
    ref = mlp2_reference(obj_pose, params)
    assert out.shape == (B, 3) and out.dtype == jnp.float32
    assert jnp.allclose(out, ref, atol=1e-5, rtol=1e-5)

    # Batch-tiled path (weights VMEM-resident across grid steps, parallel batch axis).
    B2 = 64
    key, kx2 = jax.random.split(key)
    obj_pose2 = jax.random.normal(kx2, (B2, 6), dtype=jnp.float32)
    out2 = jax.block_until_ready(mlp2_forward(obj_pose2, params, tile_b=16))
    ref2 = mlp2_reference(obj_pose2, params)
    assert out2.shape == (B2, 3)
    assert jnp.allclose(out2, ref2, atol=1e-5, rtol=1e-5)

    print("KERNEL_OK")
</pallas_src>

<mosaic_0001>
module attributes {stable_mosaic.version = 11 : i64} {
  func.func @_mlp2_kernel(%arg0: memref<8x6xf32, #tpu.memory_space<vmem>>, %arg1: memref<6x64xf32, #tpu.memory_space<vmem>>, %arg2: memref<1x64xf32, #tpu.memory_space<vmem>>, %arg3: memref<64x64xf32, #tpu.memory_space<vmem>>, %arg4: memref<1x64xf32, #tpu.memory_space<vmem>>, %arg5: memref<64x192xf32, #tpu.memory_space<vmem>>, %arg6: memref<1x192xf32, #tpu.memory_space<vmem>>, %arg7: memref<64x64xf32, #tpu.memory_space<vmem>>, %arg8: memref<1x64xf32, #tpu.memory_space<vmem>>, %arg9: memref<64x2xf32, #tpu.memory_space<vmem>>, %arg10: memref<1x2xf32, #tpu.memory_space<vmem>>, %arg11: memref<128x1xf32, #tpu.memory_space<vmem>>, %arg12: memref<1x1xf32, #tpu.memory_space<vmem>>, %arg13: memref<8x3xf32, #tpu.memory_space<vmem>>) attributes {dimension_semantics = [], scalar_prefetch = 0 : i64, scratch_operands = 0 : i64, tpu.core_type = #tpu.core_type<tc>} {
    %c0 = arith.constant 0 : index
    %c0_0 = arith.constant 0 : index
    %0 = vector.load %arg0[%c0, %c0_0] : memref<8x6xf32, #tpu.memory_space<vmem>>, vector<8x6xf32>
    %c0_1 = arith.constant 0 : index
    %c0_2 = arith.constant 0 : index
    %1 = vector.load %arg1[%c0_1, %c0_2] : memref<6x64xf32, #tpu.memory_space<vmem>>, vector<6x64xf32>
    %cst = arith.constant dense<0.000000e+00> : vector<8x64xf32>
    %2 = tpu.matmul %0, %1, %cst {dimension_numbers = #tpu.dot_dimension_numbers<[1], [0], [0], [1], [0, 0, 1, 1], [], []>} : vector<8x6xf32>, vector<6x64xf32>, vector<8x64xf32> -> vector<8x64xf32>
    %c0_3 = arith.constant 0 : index
    %c0_4 = arith.constant 0 : index
    %3 = vector.load %arg2[%c0_3, %c0_4] : memref<1x64xf32, #tpu.memory_space<vmem>>, vector<1x64xf32>
    %4 = vector.broadcast %3 : vector<1x64xf32> to vector<8x64xf32>
    %5 = arith.addf %2, %4 : vector<8x64xf32>
    %cst_5 = arith.constant 0.000000e+00 : f32
    %6 = vector.broadcast %cst_5 : f32 to vector<8x64xf32>
    %7 = arith.maximumf %5, %6 : vector<8x64xf32>
    %c0_6 = arith.constant 0 : index
    %c0_7 = arith.constant 0 : index
    %8 = vector.load %arg3[%c0_6, %c0_7] : memref<64x64xf32, #tpu.memory_space<vmem>>, vector<64x64xf32>
    %cst_8 = arith.constant dense<0.000000e+00> : vector<8x64xf32>
    %9 = tpu.matmul %7, %8, %cst_8 {dimension_numbers = #tpu.dot_dimension_numbers<[1], [0], [0], [1], [0, 0, 1, 1], [], []>} : vector<8x64xf32>, vector<64x64xf32>, vector<8x64xf32> -> vector<8x64xf32>
    %c0_9 = arith.constant 0 : index
    %c0_10 = arith.constant 0 : index
    %10 = vector.load %arg4[%c0_9, %c0_10] : memref<1x64xf32, #tpu.memory_space<vmem>>, vector<1x64xf32>
    %11 = vector.broadcast %10 : vector<1x64xf32> to vector<8x64xf32>
    %12 = arith.addf %9, %11 : vector<8x64xf32>
    %cst_11 = arith.constant 0.000000e+00 : f32
    %13 = vector.broadcast %cst_11 : f32 to vector<8x64xf32>
    %14 = arith.maximumf %12, %13 : vector<8x64xf32>
    %c0_12 = arith.constant 0 : index
    %c0_13 = arith.constant 0 : index
    %15 = vector.load %arg5[%c0_12, %c0_13] : memref<64x192xf32, #tpu.memory_space<vmem>>, vector<64x192xf32>
    %cst_14 = arith.constant dense<0.000000e+00> : vector<8x192xf32>
    %16 = tpu.matmul %14, %15, %cst_14 {dimension_numbers = #tpu.dot_dimension_numbers<[1], [0], [0], [1], [0, 0, 1, 1], [], []>} : vector<8x64xf32>, vector<64x192xf32>, vector<8x192xf32> -> vector<8x192xf32>
    %c0_15 = arith.constant 0 : index
    %c0_16 = arith.constant 0 : index
    %17 = vector.load %arg6[%c0_15, %c0_16] : memref<1x192xf32, #tpu.memory_space<vmem>>, vector<1x192xf32>
    %18 = vector.broadcast %17 : vector<1x192xf32> to vector<8x192xf32>
    %19 = arith.addf %16, %18 : vector<8x192xf32>
    %cst_17 = arith.constant 0.000000e+00 : f32
    %20 = vector.broadcast %cst_17 : f32 to vector<8x192xf32>
    %21 = arith.maximumf %19, %20 : vector<8x192xf32>
    %22 = vector.extract_strided_slice %21 {offsets = [0, 0], sizes = [8, 128], strides = [1, 1]} : vector<8x192xf32> to vector<8x128xf32>
    %23 = vector.extract_strided_slice %21 {offsets = [0, 128], sizes = [8, 64], strides = [1, 1]} : vector<8x192xf32> to vector<8x64xf32>
    %c0_18 = arith.constant 0 : index
    %c0_19 = arith.constant 0 : index
    %24 = vector.load %arg7[%c0_18, %c0_19] : memref<64x64xf32, #tpu.memory_space<vmem>>, vector<64x64xf32>
    %cst_20 = arith.constant dense<0.000000e+00> : vector<8x64xf32>
    %25 = tpu.matmul %23, %24, %cst_20 {dimension_numbers = #tpu.dot_dimension_numbers<[1], [0], [0], [1], [0, 0, 1, 1], [], []>} : vector<8x64xf32>, vector<64x64xf32>, vector<8x64xf32> -> vector<8x64xf32>
    %c0_21 = arith.constant 0 : index
    %c0_22 = arith.constant 0 : index
    %26 = vector.load %arg8[%c0_21, %c0_22] : memref<1x64xf32, #tpu.memory_space<vmem>>, vector<1x64xf32>
    %27 = vector.broadcast %26 : vector<1x64xf32> to vector<8x64xf32>
    %28 = arith.addf %25, %27 : vector<8x64xf32>
    %cst_23 = arith.constant 0.000000e+00 : f32
    %29 = vector.broadcast %cst_23 : f32 to vector<8x64xf32>
    %30 = arith.maximumf %28, %29 : vector<8x64xf32>
    %c0_24 = arith.constant 0 : index
    %c0_25 = arith.constant 0 : index
    %31 = vector.load %arg9[%c0_24, %c0_25] : memref<64x2xf32, #tpu.memory_space<vmem>>, vector<64x2xf32>
    %cst_26 = arith.constant dense<0.000000e+00> : vector<8x2xf32>
    %32 = tpu.matmul %30, %31, %cst_26 {dimension_numbers = #tpu.dot_dimension_numbers<[1], [0], [0], [1], [0, 0, 1, 1], [], []>} : vector<8x64xf32>, vector<64x2xf32>, vector<8x2xf32> -> vector<8x2xf32>
    %c0_27 = arith.constant 0 : index
    %c0_28 = arith.constant 0 : index
    %33 = vector.load %arg10[%c0_27, %c0_28] : memref<1x2xf32, #tpu.memory_space<vmem>>, vector<1x2xf32>
    %34 = vector.broadcast %33 : vector<1x2xf32> to vector<8x2xf32>
    %35 = arith.addf %32, %34 : vector<8x2xf32>
    %c0_29 = arith.constant 0 : index
    %c0_30 = arith.constant 0 : index
    %36 = vector.load %arg11[%c0_29, %c0_30] : memref<128x1xf32, #tpu.memory_space<vmem>>, vector<128x1xf32>
    %cst_31 = arith.constant dense<0.000000e+00> : vector<8x1xf32>
    %37 = tpu.matmul %22, %36, %cst_31 {dimension_numbers = #tpu.dot_dimension_numbers<[1], [0], [0], [1], [0, 0, 1, 1], [], []>} : vector<8x128xf32>, vector<128x1xf32>, vector<8x1xf32> -> vector<8x1xf32>
    %c0_32 = arith.constant 0 : index
    %c0_33 = arith.constant 0 : index
    %38 = vector.load %arg12[%c0_32, %c0_33] : memref<1x1xf32, #tpu.memory_space<vmem>>, vector<1x1xf32>
    %39 = vector.broadcast %38 : vector<1x1xf32> to vector<8x1xf32>
    %40 = arith.addf %37, %39 : vector<8x1xf32>
    %41 = math.tanh %40 : vector<8x1xf32>
    %cst_34 = arith.constant 1.57079637 : f32
    %42 = vector.broadcast %cst_34 : f32 to vector<8x1xf32>
    %43 = arith.mulf %42, %41 : vector<8x1xf32>
    %c0_35 = arith.constant 0 : index
    %c0_36 = arith.constant 0 : index
    %44 = vector.load %arg13[%c0_35, %c0_36] : memref<8x3xf32, #tpu.memory_space<vmem>>, vector<8x2xf32>
    tpu.vector_store %arg13[%c0_35, %c0_36], %35 {strides = array<i32>} : memref<8x3xf32, #tpu.memory_space<vmem>>, vector<8x2xf32>,
    %c0_37 = arith.constant 0 : index
    %c2 = arith.constant 2 : index
    %45 = vector.load %arg13[%c0_37, %c2] : memref<8x3xf32, #tpu.memory_space<vmem>>, vector<8x1xf32>
    tpu.vector_store %arg13[%c0_37, %c2], %43 {strides = array<i32>} : memref<8x3xf32, #tpu.memory_space<vmem>>, vector<8x1xf32>,
    return
  }
}

</mosaic_0001>

<bundles_post_ra>
// kernel: tpu_custom_call.1
= control target key start
LH: loop header
LB: loop body
LE: loop exit
PB: predicated region body
PF: predicated region fallthrough
CT: control target
= control target key end

     0   :  { %s834_s0 = inlined_call_operand.vmem [shape: f32[8,6], index: 0, kind: input, shape index: {}]   ;;  %s835_s1 = inlined_call_operand.hbm [shape: f32[6,64], index: 1, kind: input, shape index: {}]   ;;  %s836_s2 = inlined_call_operand.hbm [shape: f32[1,64], index: 2, kind: input, shape index: {}]   ;;  %s837_s3 = inlined_call_operand.vmem [shape: f32[64,64], index: 3, kind: input, shape index: {}]   ;;  %s838_s4 = inlined_call_operand.hbm [shape: f32[1,64], index: 4, kind: input, shape index: {}]   ;;  %s839_s5 = inlined_call_operand.vmem [shape: f32[64,192], index: 5, kind: input, shape index: {}]   ;;  %s840_s6 = inlined_call_operand.hbm [shape: f32[1,192], index: 6, kind: input, shape index: {}]   ;;  %s841_s7 = inlined_call_operand.hbm [shape: f32[64,64], index: 7, kind: input, shape index: {}]   ;;  %s842_s8 = inlined_call_operand.hbm [shape: f32[1,64], index: 8, kind: input, shape index: {}]   ;;  %s843_s9 = inlined_call_operand.vmem [shape: f32[64,2], index: 9, kind: input, shape index: {}]   ;;  %s844_s10 = inlined_call_operand.vmem [shape: f32[1,2], index: 10, kind: input, shape index: {}]   ;;  %s845_s11 = inlined_call_operand.vmem [shape: f32[128,1], index: 11, kind: input, shape index: {}]   ;;  %s846_s12 = inlined_call_operand.<no memory space> [shape: f32[1,1], index: 12, kind: input, shape index: {}]   ;;  %s847_s13 = inlined_call_operand.vmem [shape: f32[8,3], index: 13, kind: output, shape index: {}]  }
   0x1   :  { %v18_v0 = vstv %s846_s12 }
   0x2   :  { %19 = vst [vmem:[#allocation2] sm:$0x1] %v18_v0 }
   0x3   :  { %20 = vsyncpa [#allocation4], 0 }
   0x4   :  { %21 = vsyncpa [#allocation6], 0 }
   0x5   :  { %22 = vsyncpa [#allocation9], 0  ;;  %s42_s29 = sshll.u32 %s836_s2, 4  ;;  %s43_s29 = int_to_ptr.hbm [resolvable:$true] %s42_s29 }
   0x6   :  { %23 = vsyncpa [#allocation12], 0  ;;  %s573_s30 = smov [#allocation5]   ;;  %s68_s17 = sshll.u32 %s840_s6, 4  ;;  %s69_s17 = int_to_ptr.hbm [resolvable:$true] %s68_s17 }
   0x7   :  { %s44_s14 = sshll.u32 %s573_s30, 4  ;;  %s574_s12 = smov [#allocation8]   ;;  %s45_s14 = int_to_ptr.vmem [resolvable:$true] %s44_s14 }
   0x8   :  { %47 = dma.hbm_to_vmem [thread:$0]  %s43_s29, 16, %s45_s14, [#allocation6]  }
   0x9   :  { %s70_s18 = sshll.u32 %s574_s12, 4  ;;  %s31_s21 = sshll.u32 %s835_s1, 4  ;;  %s71_s18 = int_to_ptr.vmem [resolvable:$true] %s70_s18  ;;  %s32_s21 = int_to_ptr.hbm [resolvable:$true] %s31_s21 }
   0xa   :  { %73 = dma.hbm_to_vmem [thread:$0]  %s69_s17, 32, %s71_s18, [#allocation9]  }
   0xb   :  { %s55_s23 = sshll.u32 %s838_s4, 4  ;;  %s575_s24 = smov [#allocation3]   ;;  %s56_s23 = int_to_ptr.hbm [resolvable:$true] %s55_s23 }
   0xc   :  { %s33_s25 = sshll.u32 %s575_s24, 4  ;;  %s576_s6 = smov [#allocation7]   ;;  %s34_s25 = int_to_ptr.vmem [resolvable:$true] %s33_s25 }
   0xd   :  { %36 = dma.hbm_to_vmem [thread:$0]  %s32_s21, 128, %s34_s25, [#allocation4]  }
   0xe   :  { %s57_s26 = sshll.u32 %s576_s6, 4  ;;  %s78_s29 = sshll.u32 %s841_s7, 4  ;;  %s58_s26 = int_to_ptr.vmem [resolvable:$true] %s57_s26  ;;  %s79_s29 = int_to_ptr.hbm [resolvable:$true] %s78_s29 }
   0xf   :  { %60 = dma.hbm_to_vmem [thread:$0]  %s56_s23, 16, %s58_s26, [#allocation6]  }
  0x10   :  { %s577_s1 = smov [#allocation10]   ;;  %s92_s4 = sshll.u32 %s842_s8, 4  ;;  %s93_s4 = int_to_ptr.hbm [resolvable:$true] %s92_s4 }
  0x11   :  { %s80_s30 = sshll.u32 %s577_s1, 4  ;;  %s578_s16 = smov 128   ;;  %s81_s30 = int_to_ptr.vmem [resolvable:$true] %s80_s30 }
  0x12   :  { %s579_s17 = smov 8   ;;  %s580_s12 = smov [#allocation11]  }
  0x13   :  { %86 = dma.hbm_to_vmem [thread:$0]  %s79_s29, 1024, %s81_s30, [#allocation9], %s578_s16, %s578_s16, %s579_s17  }
  0x14   :  { %s94_s18 = sshll.u32 %s580_s12, 4  ;;  %s95_s18 = int_to_ptr.vmem [resolvable:$true] %s94_s18 }
  0x15   :  { %97 = dma.hbm_to_vmem [thread:$0]  %s93_s4, 16, %s95_s18, [#allocation12]  }
  0x16   :  { %565 = dma.done.wait [#allocation4], 128  }
  0x17   :  { %566 = vsyncadd [#allocation4], 4294967168 }
  0x18   :  { %567 = dma.done.wait [#allocation6], 32  }
  0x19   :  { %568 = vsyncadd [#allocation6], 4294967264 }
  0x1a   :  { %569 = dma.done.wait [#allocation9], 1056  }
  0x1b   :  { %570 = vsyncadd [#allocation9], 4294966240 }
  0x1c   :  { %571 = dma.done.wait [#allocation12], 16  }
  0x1d   :  { %572 = vsyncadd [#allocation12], 4294967280  ;;  %vm140_vm0 = vcmask 1045504   ;;  %vm136_vm1 = vcmask 48128   ;;  %v131_v1 = vld [vmem:[#allocation3] sm:$0x3f] }
  0x1e   :  { %v130_v2 = vld [vmem:[%s834_s0] sm:$0xff]  ;;  %v172_v3 = vld [vmem:[%s837_s3 + $0x38] sm:$0xff]  ;;  %398 = vmatpush.msk.msra.mxu0 %vm140_vm0, %v131_v1  ;;  %v171_v4 = vld [vmem:[%s837_s3 + $0x30] sm:$0xff]  ;;  %vm177_vm2 = vcmask 523264   ;;  %s581_s30 = smov 2   ;;  %vm382_vm3 = vcmask 15360  }
  0x1f   :  { %189 = vmatpush.msra.mxu1 %v172_v3  ;;  %399 = vmatmul.msk.f32.vlgmr.msra.gmra.mxu0 %vm136_vm1, %v130_v2  ;;  %v170_v5 = vld [vmem:[%s837_s3 + $0x28] sm:$0xff]  ;;  %v169_v6 = vld [vmem:[%s837_s3 + $0x20] sm:$0xff]  ;;  %v168_v7 = vld [vmem:[%s837_s3 + $0x18] sm:$0xff]  ;;  %vm388_vm4 = vcmask 23568  }
  0x20   :  { %v167_v8 = vld [vmem:[%s837_s3 + $0x10] sm:$0xff]  ;;  %v166_v9 = vld [vmem:[%s837_s3 + $0x8] sm:$0xff]  ;;  %v165_v10 = vld [vmem:[%s837_s3] sm:$0xff] }
  0x21   :  { %190 = vmatpush.msra.mxu1 %v171_v4  ;;  %v216_v11 = vld [vmem:[%s839_s5 + $0x70] sm:$0xff]  ;;  %v214_v12 = vld [vmem:[%s839_s5 + $0x60] sm:$0xff]  ;;  %v217_v19 = vld [vmem:[%s839_s5 + $0x78] sm:$0xff] }
  0x22   :  { %235 = vmatpush.msra.mxu3 %v216_v11  ;;  %v212_v13 = vld [vmem:[%s839_s5 + $0x50] sm:$0xff]  ;;  %v210_v14 = vld [vmem:[%s839_s5 + $0x40] sm:$0xff]  ;;  %v414_v20 = vld [vmem:[#allocation5] ss:$0 sm:$0xff] }
  0x23   :  { %191 = vmatpush.msra.mxu1 %v170_v5  ;;  %v208_v15 = vld [vmem:[%s839_s5 + $0x30] sm:$0xff]  ;;  %v206_v16 = vld [vmem:[%s839_s5 + $0x20] sm:$0xff]  ;;  %v215_v24 = vld [vmem:[%s839_s5 + $0x68] sm:$0xff] }
  0x24   :  { %236 = vmatpush.msra.mxu3 %v214_v12  ;;  %v204_v17 = vld [vmem:[%s839_s5 + $0x10] sm:$0xff]  ;;  %v202_v18 = vld [vmem:[%s839_s5] sm:$0xff]  ;;  %v213_v25 = vld [vmem:[%s839_s5 + $0x58] sm:$0xff] }
  0x25   :  { %192 = vmatpush.msra.mxu1 %v169_v6  ;;  %v211_v26 = vld [vmem:[%s839_s5 + $0x48] sm:$0xff]  ;;  %v209_v27 = vld [vmem:[%s839_s5 + $0x38] sm:$0xff]  ;;  %v354_v32 = vld [vmem:[%s845_s11 + $0x70] sm:$0xff] }
  0x26   :  { %237 = vmatpush.msra.mxu3 %v212_v13  ;;  %v207_v28 = vld [vmem:[%s839_s5 + $0x28] sm:$0xff]  ;;  %v205_v29 = vld [vmem:[%s839_s5 + $0x18] sm:$0xff]  ;;  %v352_v34 = vld [vmem:[%s845_s11 + $0x60] sm:$0xff] }
  0x27   :  { %193 = vmatpush.msra.mxu1 %v168_v7  ;;  %v203_v30 = vld [vmem:[%s839_s5 + $0x8] sm:$0xff]  ;;  %v355_v31 = vld [vmem:[%s845_s11 + $0x78] sm:$0xff]  ;;  %v350_v37 = vld [vmem:[%s845_s11 + $0x50] sm:$0xff] }
  0x28   :  { %238 = vmatpush.msra.mxu3 %v210_v14  ;;  %360 = vmatpush.msra.mxu2 %v355_v31  ;;  %v353_v33 = vld [vmem:[%s845_s11 + $0x68] sm:$0xff]  ;;  %v351_v36 = vld [vmem:[%s845_s11 + $0x58] sm:$0xff]  ;;  %v348_v39 = vld [vmem:[%s845_s11 + $0x40] sm:$0xff] }
  0x29   :  { %194 = vmatpush.msra.mxu1 %v167_v8  ;;  %v276_v35 = vld [vmem:[#allocation10 + $0x38] sm:$0xff]  ;;  %v347_v40 = vld [vmem:[%s845_s11 + $0x38] sm:$0xff]  ;;  %v346_v42 = vld [vmem:[%s845_s11 + $0x30] sm:$0xff] }
  0x2a   :  { %239 = vmatpush.msra.mxu3 %v208_v15  ;;  %361 = vmatpush.msra.mxu2 %v354_v32  ;;  %v349_v38 = vld [vmem:[%s845_s11 + $0x48] sm:$0xff]  ;;  %v344_v46 = vld [vmem:[%s845_s11 + $0x20] sm:$0xff]  ;;  %v343_v48 = vld [vmem:[%s845_s11 + $0x18] sm:$0xff] }
  0x2b   :  { %195 = vmatpush.msra.mxu1 %v166_v9  ;;  %292 = vmatpush.msrb.mxu0 %v276_v35  ;;  %v415_v41 = vld [vmem:[#allocation7] ss:$0 sm:$0xff]  ;;  %v275_v49 = vld [vmem:[#allocation10 + $0x30] sm:$0xff]  ;;  %v342_v50 = vld [vmem:[%s845_s11 + $0x10] sm:$0xff] }
  0x2c   :  { %240 = vmatpush.msra.mxu3 %v206_v16  ;;  %362 = vmatpush.msra.mxu2 %v353_v33  ;;  %v345_v43 = vld [vmem:[%s845_s11 + $0x28] sm:$0xff]  ;;  %v274_v51 = vld [vmem:[#allocation10 + $0x28] sm:$0xff]  ;;  %v340_v54 = vld [vmem:[%s845_s11] sm:$0xff] }
  0x2d   :  { %196 = vmatpush.msra.mxu1 %v165_v10  ;;  %293 = vmatpush.msrb.mxu0 %v275_v49  ;;  %v341_v52 = vld [vmem:[%s845_s11 + $0x8] sm:$0xff]  ;;  %v271_v56 = vld [vmem:[#allocation10 + $0x10] sm:$0xff]  ;;  %v270_v57 = vld [vmem:[#allocation10 + $0x8] sm:$0xff] }
  0x2e   :  { %241 = vmatpush.msra.mxu3 %v204_v17  ;;  %363 = vmatpush.msra.mxu2 %v352_v34  ;;  %v273_v53 = vld [vmem:[#allocation10 + $0x20] sm:$0xff]  ;;  %v272_v55 = vld [vmem:[#allocation10 + $0x18] sm:$0xff]  ;;  %v312_v59 = vld [vmem:[%s843_s9 + $0x38] sm:$0xff] }
  0x2f   :  { %294 = vmatpush.msrb.mxu0 %v274_v51  ;;  %v269_v58 = vld [vmem:[#allocation10] sm:$0xff]  ;;  %328 = vmatpush.msrb.mxu1 %v312_v59  ;;  %v309_v62 = vld [vmem:[%s843_s9 + $0x20] sm:$0xff]  ;;  %v308_v63 = vld [vmem:[%s843_s9 + $0x18] sm:$0xff] }
  0x30   :  { %242 = vmatpush.msra.mxu3 %v202_v18  ;;  %364 = vmatpush.msra.mxu2 %v351_v36  ;;  %v311_v60 = vld [vmem:[%s843_s9 + $0x30] sm:$0xff]  ;;  %v310_v61 = vld [vmem:[%s843_s9 + $0x28] sm:$0xff]  ;;  %v305_v11 = vld [vmem:[%s843_s9] sm:$0xff] }
  0x31   :  { %295 = vmatpush.msrb.mxu0 %v273_v53  ;;  %329 = vmatpush.msrb.mxu1 %v311_v60  ;;  %v218_v0 = vld [vmem:[#allocation8] sm:$0x3]  ;;  %v307_v9 = vld [vmem:[%s843_s9 + $0x10] sm:$0xff]  ;;  %v416_v12 = vld [vmem:[#allocation2] ss:$0 sm:$0xff] }
  0x32   :  { %255 = vmatpush.msrb.mxu3 %v217_v19  ;;  %365 = vmatpush.msra.mxu2 %v350_v37  ;;  %v220_v1 = vperm.slane %v218_v0, 0  ;;  %v221_v5 = vperm.slane %v218_v0, 1  ;;  %v306_v10 = vld [vmem:[%s843_s9 + $0x8] sm:$0xff] }
  0x33   :  { %296 = vmatpush.msrb.mxu0 %v272_v55  ;;  %330 = vmatpush.msrb.mxu1 %v310_v61  ;;  %v417_v13 = vld [vmem:[#allocation11] ss:$0 sm:$0xff] }
  0x34   :  { %256 = vmatpush.msrb.mxu3 %v215_v24  ;;  %366 = vmatpush.msra.mxu2 %v349_v38 }
  0x35   :  { %297 = vmatpush.msrb.mxu0 %v271_v56  ;;  %331 = vmatpush.msrb.mxu1 %v309_v62 }
  0x36   :  { %257 = vmatpush.msrb.mxu3 %v213_v25  ;;  %367 = vmatpush.msra.mxu2 %v348_v39 }
  0x37   :  { %298 = vmatpush.msrb.mxu0 %v270_v57  ;;  %332 = vmatpush.msrb.mxu1 %v308_v63 }
  0x38   :  { %258 = vmatpush.msrb.mxu3 %v211_v26  ;;  %368 = vmatpush.msra.mxu2 %v347_v40 }
  0x39   :  { %299 = vmatpush.msrb.mxu0 %v269_v58  ;;  %333 = vmatpush.msrb.mxu1 %v307_v9 }
  0x3a   :  { %259 = vmatpush.msrb.mxu3 %v209_v27  ;;  %369 = vmatpush.msra.mxu2 %v346_v42 }
  0x3b   :  { %334 = vmatpush.msrb.mxu1 %v306_v10 }
  0x3c   :  { %260 = vmatpush.msrb.mxu3 %v207_v28  ;;  %370 = vmatpush.msra.mxu2 %v345_v43 }
  0x3d   :  { %335 = vmatpush.msrb.mxu1 %v305_v11 }
  0x3e   :  { %261 = vmatpush.msrb.mxu3 %v205_v29  ;;  %371 = vmatpush.msra.mxu2 %v344_v46 }
  0x40   :  { %262 = vmatpush.msrb.mxu3 %v203_v30  ;;  %372 = vmatpush.msra.mxu2 %v343_v48 }
  0x42   :  { %373 = vmatpush.msra.mxu2 %v342_v50 }
  0x44   :  { %374 = vmatpush.msra.mxu2 %v341_v52 }
  0x46   :  { %375 = vmatpush.msra.mxu2 %v340_v54 }
  0x9c   :  { %v161_v21 = vpop.f32.mrf.mxu0 }
  0x9d   :  { %v162_v22 = vadd.f32 %v414_v20, %v161_v21  ;;  %v418_v21 = vld [vmem:[%s844_s10] ss:$0 sm:$0xff] }
  0x9f   :  { %v164_v23 = vmax.f32 %v162_v22, 0.0 }
  0xa1   :  { %400 = vmatmul.msk.f32.vlgmr.msra.gmra.mxu1 %vm177_vm2, %v164_v23 }
 0x11e   :  { %v198_v44 = vpop.f32.mrf.mxu1 }
 0x11f   :  { %v199_v45 = vadd.f32 %v415_v41, %v198_v44 }
 0x121   :  { %v201_v47 = vmax.f32 %v199_v45, 0.0 }
 0x123   :  { %401 = vmatmul.msk.f32.vlgmr.msra.gmra.mxu3 %vm177_vm2, %v201_v47 }
 0x12b   :  { %402 = vmatmul.msk.f32.vlgmr.msrb.gmra.mxu3 %vm177_vm2, %v201_v47 }
 0x1a6   :  { %v244_v2 = vpop.f32.mrf.mxu3 }
 0x1a7   :  { %v245_v3 = vadd.f32 %v244_v2, %v220_v1 }
 0x1a9   :  { %v267_v4 = vmax.f32 %v245_v3, 0.0 }
 0x1ab   :  { %376 = vmatmul.f32.vlgmr.msra.gmra.mxu2 %v267_v4 }
 0x1ae   :  { %v264_v6 = vpop.f32.mrf.mxu3 }
 0x1af   :  { %v265_v7 = vadd.f32 %v264_v6, %v221_v5 }
 0x1b1   :  { %v268_v8 = vmax.f32 %v265_v7, 0.0 }
 0x1b3   :  { %403 = vmatmul.msk.f32.vlgmr.msrb.gmra.mxu0 %vm177_vm2, %v268_v8 }
 0x22e   :  { %v377_v14 = vpop.f32.mrf.mxu2 }
 0x22f   :  { %v378_v15 = vadd.f32 %v416_v12, %v377_v14 }
 0x230   :  { %v301_v16 = vpop.f32.mrf.mxu0 }
 0x231   :  { %419 = vtanh.f32 %v378_v15  ;;  %v302_v17 = vadd.f32 %v417_v13, %v301_v16 }
 0x233   :  { %v304_v18 = vmax.f32 %v302_v17, 0.0 }
 0x235   :  { %404 = vmatmul.msk.f32.vlgmr.msrb.gmra.mxu1 %vm177_vm2, %v304_v18 }
 0x237   :  { %v420_v19 = vpop.eup %419 }
 0x238   :  { %v381_v20 = vmul.f32 1.5707964, %v420_v19 }
 0x23a   :  { %385 = vrot.lane.b32.xlu0 %v381_v20, %s581_s30 }
 0x2ac   :  { %v386_v24 = vpop.permute.xlu0 %385 }
 0x2b2   :  { %v337_v22 = vpop.f32.mrf.mxu1 }
 0x2b3   :  { %v338_v23 = vadd.f32 %v418_v21, %v337_v22 }
 0x2b5   :  { %383 = vst.msk [vmem:[%s847_s13] sm:$0xff] %vm382_vm3, %v338_v23 }
 0x2b6   :  { %389 = vst.msk [vmem:[%s847_s13] sm:$0xff] %vm388_vm4, %v386_v24 }
 0x2b7   :  { %394 = vsyncpa [#allocation4], 1 }
 0x2b8   :  { %395 = vsyncpa [#allocation6], 1 }
 0x2b9   :  { %396 = vsyncpa [#allocation9], 1 }
 0x2ba   :  { %397 = vsyncpa [#allocation12], 1 }

</bundles_post_ra>
